<compile_context>
chip_gen: v7x
topology: tpu7x:2x2x1
jax: 0.10.0
libtpu: 0.0.40
codegen_flags: <defaults>
</compile_context>

<pallas_src>
import functools

import jax
import jax.numpy as jnp
from jax.experimental import pallas as pl
from jax.experimental.pallas import tpu as pltpu

# SELU constants (match torch.nn.SELU)
_SELU_ALPHA = 1.6732632423543772
_SELU_SCALE = 1.0507009873554805
_NEG_INF = -1e30


def _round_up(n, m):
    return ((n + m - 1) // m) * m


def _cdiv(a, b):
    return -(-a // b)


def _vmem_capacity_bytes():
    """Physical VMEM of the current TPU generation (conservative fallback = v7x 64 MiB)."""
    try:
        return int(pltpu.get_tpu_info().vmem_capacity_bytes)
    except Exception:
        return 64 << 20


def _san_kernel(x_ref, whc_ref, bhc_ref, w1_ref, b1_ref, w2_ref, b2_ref, out_ref,
                *, num_heads, feat, fuse_attention):
    """One batch-tile of the SAN forward.

    x_ref  : [TB, Fpad]        input tile (bf16 storage, feature-lane padded with zeros)
    whc_ref: [Fpad, H*Fpad]    head-fused, pre-transposed, per-head lane-padded attn weights
    bhc_ref: [1, H*Fpad]       fused attention biases (f32); padded lanes = -1e30
    w1_ref : [Fpad, Hdpad]     layer-1 weight, pre-transposed, pre-scaled by 1/num_heads
    b1_ref : [1, Hdpad]        layer-1 bias (f32, zero-padded)
    w2_ref : [Hdpad, Cpad]     layer-2 weight, pre-transposed, zero-padded
    b2_ref : [1, Cpad]         layer-2 bias (f32, zero-padded)
    out_ref: [TB, Cpad]        padded logits (bf16)
    """
    x_lp = x_ref[...]                       # storage dtype for the MXU
    x_f32 = x_lp.astype(jnp.float32)        # f32 copy for elementwise work

    if fuse_attention:
        # One fused MXU call for all heads -> [TB, H*Fpad]; slices below are 128-aligned.
        logits = jnp.dot(x_lp, whc_ref[...],
                         preferred_element_type=jnp.float32) + bhc_ref[...]

    acc = jnp.zeros_like(x_f32)
    for h in range(num_heads):              # small & static -> unrolled
        lo, hi = h * feat, (h + 1) * feat
        if fuse_attention:
            lg = logits[:, lo:hi]                               # lane-tile aligned slice
        else:
            # Per-head matmul bounds the live f32 slab to [TB, Fpad] (v7x VMEM path).
            lg = (jnp.dot(x_lp, whc_ref[:, lo:hi],
                          preferred_element_type=jnp.float32) + bhc_ref[:, lo:hi])
        z = lg - jnp.max(lg, axis=-1, keepdims=True)            # pad lanes ~ -1e30 -> exp = 0
        e = jnp.exp(z)
        inv = pl.reciprocal(jnp.sum(e, axis=-1, keepdims=True), approx=True)   # EUP slot
        acc = acc + (e * inv) * x_f32
    # NOTE: the 1/num_heads mean is folded into w1 in the wrapper.

    # ---- classifier: Linear -> (Dropout = identity) -> SELU -> Linear ----
    h1 = jnp.dot(acc.astype(w1_ref.dtype), w1_ref[...],
                 preferred_element_type=jnp.float32) + b1_ref[...]          # [TB, Hdpad]
    selu = _SELU_SCALE * jnp.where(h1 > 0.0, h1, _SELU_ALPHA * (jnp.exp(h1) - 1.0))
    out = jnp.dot(selu.astype(w2_ref.dtype), w2_ref[...],
                  preferred_element_type=jnp.float32) + b2_ref[...]         # [TB, Cpad]

    out_ref[...] = out.astype(out_ref.dtype)                                # bf16 writeback


def san_forward(x, params, *, num_heads, param_dtype=jnp.bfloat16, block_b=1024):
    """Pallas wrapper: layout plumbing + generation-aware tiling + pipelined pallas_call."""
    wh, bh, w1, b1, w2, b2 = params
    B, F = x.shape
    H = num_heads
    Hd = w1.shape[0]
    C = w2.shape[0]

    Fpad = _round_up(max(F, 128), 128)
    Hdpad = _round_up(max(Hd, 128), 128)
    Cpad = _round_up(max(C, 128), 128)

    # --- head-fused, pre-transposed, per-head lane-padded attention weights ---
    # (x_pad @ whc)[:, h*Fpad : h*Fpad+F] == x @ wh[h].T ; pad lanes get bias -1e30.
    whc = jnp.zeros((Fpad, H * Fpad), param_dtype)
    bhc = jnp.full((1, H * Fpad), _NEG_INF, jnp.float32)
    for h in range(H):
        whc = whc.at[:F, h * Fpad:h * Fpad + F].set(wh[h].T.astype(param_dtype))
        bhc = bhc.at[:, h * Fpad:h * Fpad + F].set(bh[h].reshape(1, F).astype(jnp.float32))

    # --- layer 1: pre-transposed, 1/num_heads folded in, zero-padded rows/cols ---
    w1t = jnp.zeros((Fpad, Hdpad), param_dtype).at[:F, :Hd].set(
        (w1.T * (1.0 / H)).astype(param_dtype))
    b1r = jnp.zeros((1, Hdpad), jnp.float32).at[:, :Hd].set(
        b1.reshape(1, Hd).astype(jnp.float32))

    # --- layer 2: pre-transposed, zero-padded (dense lane stores) ---
    w2t = jnp.zeros((Hdpad, Cpad), param_dtype).at[:Hd, :C].set(w2.T.astype(param_dtype))
    b2r = jnp.zeros((1, Cpad), jnp.float32).at[:, :C].set(
        b2.reshape(1, C).astype(jnp.float32))

    weight_bytes = sum(int(a.size) * a.dtype.itemsize
                       for a in (whc, bhc, w1t, b1r, w2t, b2r))

    # --- generation-aware VMEM budget ---
    vmem_cap = _vmem_capacity_bytes()
    cap_use = min(vmem_cap - (12 << 20), 100 << 20)   # ~52 MiB on v7x, ~100 MiB on v5e/v6e
    cap_use = max(cap_use, 16 << 20)
    # Constant-index BlockSpec inputs are still double-buffered by default; single-buffer
    # the resident weights when that would eat the budget (v7x).
    single_buffer_weights = (2 * weight_bytes) > (cap_use // 2)

    # --- batch tiling: bound last-tile padding, prefer >= 2 grid steps for megacore ---
    SUB = 16                                  # bf16 sublane packing
    if B <= 8:
        TB = _round_up(B, 8)                  # block == full (padded) batch dim
    else:
        n_tiles = max(_cdiv(B, block_b), 1)
        if n_tiles == 1 and B >= 2 * SUB:
            n_tiles = 2                       # keep both v7x TensorCores busy
        TB = _round_up(_cdiv(B, n_tiles), SUB)

    out_itemsize = jnp.dtype(jnp.bfloat16).itemsize

    def _vmem_need(tb):
        fuse = tb * H * Fpad * 4 <= (4 << 20)          # bound the live f32 logits slab
        logits_cols = H * Fpad if fuse else Fpad
        io_tile = tb * Fpad * jnp.dtype(param_dtype).itemsize + tb * Cpad * out_itemsize
        interm = tb * (logits_cols + 2 * Fpad + 2 * Hdpad) * 4   # logits, x_f32/acc, h1/selu
        wfac = 1 if single_buffer_weights else 2
        return wfac * weight_bytes + 2 * io_tile + interm + (4 << 20), fuse

    need, fuse_attention = _vmem_need(TB)
    while need > cap_use and TB > SUB:
        TB = max(SUB, _round_up(TB // 2, SUB))
        need, fuse_attention = _vmem_need(TB)

    Bpad = _round_up(B, TB)
    vmem_limit = int(min(max(need, 16 << 20), cap_use))

    # --- input padding (batch + feature lanes); pad features are zeros ---
    x_lp = jnp.pad(x.astype(param_dtype), ((0, Bpad - B), (0, Fpad - F)))

    kernel = functools.partial(_san_kernel, num_heads=H, feat=Fpad,
                               fuse_attention=fuse_attention)

    def _wspec(shape):
        if single_buffer_weights:
            return pl.BlockSpec(shape, lambda i: (0, 0), pipeline_mode=pl.Buffered(1))
        return pl.BlockSpec(shape, lambda i: (0, 0))

    cost = pl.CostEstimate(
        flops=2 * Bpad * (Fpad * H * Fpad + Fpad * Hdpad + Hdpad * Cpad),
        transcendentals=Bpad * (H * Fpad + Hdpad),
        bytes_accessed=int(x_lp.size) * x_lp.dtype.itemsize + weight_bytes
        + Bpad * Cpad * out_itemsize,
    )

    out_padded = pl.pallas_call(
        kernel,
        out_shape=jax.ShapeDtypeStruct((Bpad, Cpad), jnp.bfloat16),
        grid=(Bpad // TB,),
        in_specs=[
            pl.BlockSpec((TB, Fpad), lambda i: (i, 0)),     # x: tiled over batch
            _wspec((Fpad, H * Fpad)),                       # weights: VMEM-resident
            _wspec((1, H * Fpad)),
            _wspec((Fpad, Hdpad)),
            _wspec((1, Hdpad)),
            _wspec((Hdpad, Cpad)),
            _wspec((1, Cpad)),
        ],
        out_specs=pl.BlockSpec((TB, Cpad), lambda i: (i, 0)),
        compiler_params=pltpu.CompilerParams(
            dimension_semantics=("parallel",),              # megacore sharding on v7x
            vmem_limit_bytes=vmem_limit,
        ),
        cost_estimate=cost,
    )(x_lp, whc, bhc, w1t, b1r, w2t, b2r)

    return out_padded[:B, :C].astype(jnp.float32)


def init_params(key, in_channels, hidden_layer_size, num_classes_sum, num_heads):
    """Deterministic init mimicking nn.Linear default (uniform in +-1/sqrt(fan_in))."""
    ks = jax.random.split(key, 6)

    def u(k, shape, fan_in):
        bound = 1.0 / jnp.sqrt(fan_in)
        return jax.random.uniform(k, shape, jnp.float32, -bound, bound)

    wh = u(ks[0], (num_heads, in_channels, in_channels), in_channels)
    bh = u(ks[1], (num_heads, in_channels), in_channels)
    w1 = u(ks[2], (hidden_layer_size, in_channels), in_channels)
    b1 = u(ks[3], (1, hidden_layer_size), in_channels)
    w2 = u(ks[4], (num_classes_sum, hidden_layer_size), hidden_layer_size)
    b2 = u(ks[5], (1, num_classes_sum), hidden_layer_size)
    return wh, bh, w1, b1, w2, b2


def san_reference(x, params, *, num_heads):
    """Pure-JAX f32 reference for numerical cross-check."""
    wh, bh, w1, b1, w2, b2 = params
    acc = jnp.zeros_like(x)
    for h in range(num_heads):
        logits = x @ wh[h].T + bh[h][None, :]
        att = jax.nn.softmax(logits, axis=1)
        acc = acc + att * x
    attended = acc / num_heads
    h1 = attended @ w1.T + b1.reshape(1, -1)
    return jax.nn.selu(h1) @ w2.T + b2.reshape(1, -1)


if __name__ == "__main__":
    # Small, module-consistent shapes: tabular input [batch, in_channels].
    batch = 8
    in_channels = 16
    hidden_layer_size = 32
    num_classes = (7, 5)          # classifier outputs sum(num_classes) logits
    num_heads = 2
    num_classes_sum = int(sum(num_classes))

    key = jax.random.PRNGKey(0)
    kx, kp = jax.random.split(key)
    x = jax.random.normal(kx, (batch, in_channels), jnp.float32)
    params = init_params(kp, in_channels, hidden_layer_size, num_classes_sum, num_heads)

    out = san_forward(x, params, num_heads=num_heads)
    out = jax.block_until_ready(out)

    # Reference uses the same bf16 quantization of x and the weight matrices as the kernel
    # (biases stay f32); tolerance covers bf16 activations/output + approx reciprocal.
    q = lambda a: a.astype(jnp.bfloat16).astype(jnp.float32)
    wh, bh, w1, b1, w2, b2 = params
    ref = san_reference(q(x), (q(wh), bh, q(w1), b1, q(w2), b2), num_heads=num_heads)

    assert out.shape == (batch, num_classes_sum), out.shape
    assert jnp.allclose(out, ref, atol=2.5e-2, rtol=2.5e-2), "mismatch vs. pure-JAX reference"

    print("KERNEL_OK")
</pallas_src>

<mosaic_0001>
module attributes {stable_mosaic.version = 11 : i64} {
  func.func @_san_kernel(%arg0: i32, %arg1: memref<8x128xbf16, #tpu.memory_space<vmem>>, %arg2: memref<128x256xbf16, #tpu.memory_space<vmem>>, %arg3: memref<1x256xf32, #tpu.memory_space<vmem>>, %arg4: memref<128x128xbf16, #tpu.memory_space<vmem>>, %arg5: memref<1x128xf32, #tpu.memory_space<vmem>>, %arg6: memref<128x128xbf16, #tpu.memory_space<vmem>>, %arg7: memref<1x128xf32, #tpu.memory_space<vmem>>, %arg8: memref<8x128xbf16, #tpu.memory_space<vmem>>) attributes {dimension_semantics = [#tpu.dimension_semantics<parallel>], iteration_bounds = array<i64: 1>, scalar_prefetch = 0 : i64, scratch_operands = 0 : i64, tpu.core_type = #tpu.core_type<tc>, window_params = [{transform_indices = @transform_0, window_bounds = array<i64: 8, 128>}, {pipeline_mode = #tpu.pipeline_mode<synchronous>, transform_indices = @transform_1, window_bounds = array<i64: 128, 256>}, {pipeline_mode = #tpu.pipeline_mode<synchronous>, transform_indices = @transform_2, window_bounds = array<i64: 1, 256>}, {pipeline_mode = #tpu.pipeline_mode<synchronous>, transform_indices = @transform_3, window_bounds = array<i64: 128, 128>}, {pipeline_mode = #tpu.pipeline_mode<synchronous>, transform_indices = @transform_4, window_bounds = array<i64: 1, 128>}, {pipeline_mode = #tpu.pipeline_mode<synchronous>, transform_indices = @transform_5, window_bounds = array<i64: 128, 128>}, {pipeline_mode = #tpu.pipeline_mode<synchronous>, transform_indices = @transform_6, window_bounds = array<i64: 1, 128>}, {transform_indices = @transform_7, window_bounds = array<i64: 8, 128>}]} {
    %c0 = arith.constant 0 : index
    %c0_0 = arith.constant 0 : index
    %0 = vector.load %arg1[%c0, %c0_0] : memref<8x128xbf16, #tpu.memory_space<vmem>>, vector<8x128xbf16>
    %1 = arith.extf %0 : vector<8x128xbf16> to vector<8x128xf32>
    %c0_1 = arith.constant 0 : index
    %c0_2 = arith.constant 0 : index
    %2 = vector.load %arg2[%c0_1, %c0_2] : memref<128x256xbf16, #tpu.memory_space<vmem>>, vector<128x256xbf16>
    %cst = arith.constant dense<0.000000e+00> : vector<8x256xf32>
    %3 = tpu.matmul %0, %2, %cst {dimension_numbers = #tpu.dot_dimension_numbers<[1], [0], [0], [1], [0, 0, 1, 1], [], []>} : vector<8x128xbf16>, vector<128x256xbf16>, vector<8x256xf32> -> vector<8x256xf32>
    %c0_3 = arith.constant 0 : index
    %c0_4 = arith.constant 0 : index
    %4 = vector.load %arg3[%c0_3, %c0_4] : memref<1x256xf32, #tpu.memory_space<vmem>>, vector<1x256xf32>
    %5 = vector.broadcast %4 : vector<1x256xf32> to vector<8x256xf32>
    %6 = arith.addf %3, %5 : vector<8x256xf32>
    %cst_5 = arith.constant 0.000000e+00 : f32
    %7 = vector.broadcast %cst_5 : f32 to vector<8x128xf32>
    %8 = vector.extract_strided_slice %6 {offsets = [0, 0], sizes = [8, 128], strides = [1, 1]} : vector<8x256xf32> to vector<8x128xf32>
    %cst_6 = arith.constant dense<0xFF800000> : vector<8xf32>
    %9 = vector.multi_reduction <maximumf>, %8, %cst_6 [1] : vector<8x128xf32> to vector<8xf32>
    %10 = vector.shape_cast %9 : vector<8xf32> to vector<8x1xf32>
    %11 = vector.broadcast %10 : vector<8x1xf32> to vector<8x128xf32>
    %12 = arith.subf %8, %11 : vector<8x128xf32>
    %13 = math.exp %12 : vector<8x128xf32>
    %cst_7 = arith.constant dense<0.000000e+00> : vector<8xf32>
    %14 = vector.multi_reduction <add>, %13, %cst_7 [1] : vector<8x128xf32> to vector<8xf32>
    %15 = vector.shape_cast %14 : vector<8xf32> to vector<8x1xf32>
    %16 = tpu.reciprocal %15 {approx = true} : vector<8x1xf32> -> vector<8x1xf32>
    %17 = vector.broadcast %16 : vector<8x1xf32> to vector<8x128xf32>
    %18 = arith.mulf %13, %17 : vector<8x128xf32>
    %19 = arith.mulf %18, %1 : vector<8x128xf32>
    %20 = arith.addf %7, %19 : vector<8x128xf32>
    %21 = vector.extract_strided_slice %6 {offsets = [0, 128], sizes = [8, 128], strides = [1, 1]} : vector<8x256xf32> to vector<8x128xf32>
    %cst_8 = arith.constant dense<0xFF800000> : vector<8xf32>
    %22 = vector.multi_reduction <maximumf>, %21, %cst_8 [1] : vector<8x128xf32> to vector<8xf32>
    %23 = vector.shape_cast %22 : vector<8xf32> to vector<8x1xf32>
    %24 = vector.broadcast %23 : vector<8x1xf32> to vector<8x128xf32>
    %25 = arith.subf %21, %24 : vector<8x128xf32>
    %26 = math.exp %25 : vector<8x128xf32>
    %cst_9 = arith.constant dense<0.000000e+00> : vector<8xf32>
    %27 = vector.multi_reduction <add>, %26, %cst_9 [1] : vector<8x128xf32> to vector<8xf32>
    %28 = vector.shape_cast %27 : vector<8xf32> to vector<8x1xf32>
    %29 = tpu.reciprocal %28 {approx = true} : vector<8x1xf32> -> vector<8x1xf32>
    %30 = vector.broadcast %29 : vector<8x1xf32> to vector<8x128xf32>
    %31 = arith.mulf %26, %30 : vector<8x128xf32>
    %32 = arith.mulf %31, %1 : vector<8x128xf32>
    %33 = arith.addf %20, %32 : vector<8x128xf32>
    %34 = arith.truncf %33 : vector<8x128xf32> to vector<8x128xbf16>
    %c0_10 = arith.constant 0 : index
    %c0_11 = arith.constant 0 : index
    %35 = vector.load %arg4[%c0_10, %c0_11] : memref<128x128xbf16, #tpu.memory_space<vmem>>, vector<128x128xbf16>
    %cst_12 = arith.constant dense<0.000000e+00> : vector<8x128xf32>
    %36 = tpu.matmul %34, %35, %cst_12 {dimension_numbers = #tpu.dot_dimension_numbers<[1], [0], [0], [1], [0, 0, 1, 1], [], []>} : vector<8x128xbf16>, vector<128x128xbf16>, vector<8x128xf32> -> vector<8x128xf32>
    %c0_13 = arith.constant 0 : index
    %c0_14 = arith.constant 0 : index
    %37 = vector.load %arg5[%c0_13, %c0_14] : memref<1x128xf32, #tpu.memory_space<vmem>>, vector<1x128xf32>
    %38 = vector.broadcast %37 : vector<1x128xf32> to vector<8x128xf32>
    %39 = arith.addf %36, %38 : vector<8x128xf32>
    %cst_15 = arith.constant 0.000000e+00 : f32
    %40 = vector.broadcast %cst_15 : f32 to vector<8x128xf32>
    %41 = arith.cmpf ogt, %39, %40 : vector<8x128xf32>
    %42 = math.exp %39 : vector<8x128xf32>
    %cst_16 = arith.constant 1.000000e+00 : f32
    %43 = vector.broadcast %cst_16 : f32 to vector<8x128xf32>
    %44 = arith.subf %42, %43 : vector<8x128xf32>
    %cst_17 = arith.constant 1.67326319 : f32
    %45 = vector.broadcast %cst_17 : f32 to vector<8x128xf32>
    %46 = arith.mulf %45, %44 : vector<8x128xf32>
    %47 = arith.select %41, %39, %46 : vector<8x128xi1>, vector<8x128xf32>
    %cst_18 = arith.constant 1.05070102 : f32
    %48 = vector.broadcast %cst_18 : f32 to vector<8x128xf32>
    %49 = arith.mulf %48, %47 : vector<8x128xf32>
    %50 = arith.truncf %49 : vector<8x128xf32> to vector<8x128xbf16>
    %c0_19 = arith.constant 0 : index
    %c0_20 = arith.constant 0 : index
    %51 = vector.load %arg6[%c0_19, %c0_20] : memref<128x128xbf16, #tpu.memory_space<vmem>>, vector<128x128xbf16>
    %cst_21 = arith.constant dense<0.000000e+00> : vector<8x128xf32>
    %52 = tpu.matmul %50, %51, %cst_21 {dimension_numbers = #tpu.dot_dimension_numbers<[1], [0], [0], [1], [0, 0, 1, 1], [], []>} : vector<8x128xbf16>, vector<128x128xbf16>, vector<8x128xf32> -> vector<8x128xf32>
    %c0_22 = arith.constant 0 : index
    %c0_23 = arith.constant 0 : index
    %53 = vector.load %arg7[%c0_22, %c0_23] : memref<1x128xf32, #tpu.memory_space<vmem>>, vector<1x128xf32>
    %54 = vector.broadcast %53 : vector<1x128xf32> to vector<8x128xf32>
    %55 = arith.addf %52, %54 : vector<8x128xf32>
    %56 = arith.truncf %55 : vector<8x128xf32> to vector<8x128xbf16>
    %c0_24 = arith.constant 0 : index
    %c0_25 = arith.constant 0 : index
    %57 = vector.load %arg8[%c0_24, %c0_25] : memref<8x128xbf16, #tpu.memory_space<vmem>>, vector<8x128xbf16>
    tpu.vector_store %arg8[%c0_24, %c0_25], %56 {strides = array<i32>} : memref<8x128xbf16, #tpu.memory_space<vmem>>, vector<8x128xbf16>,
    return
  }
  func.func @transform_0(%arg0: i32) -> (i32, i32) {
    %c0_i32 = arith.constant 0 : i32
    %c0_i32_0 = arith.constant 0 : i32
    return %arg0, %c0_i32 : i32, i32
  }
  func.func @transform_1(%arg0: i32) -> (i32, i32) {
    %c0_i32 = arith.constant 0 : i32
    %c0_i32_0 = arith.constant 0 : i32
    %c0_i32_1 = arith.constant 0 : i32
    return %c0_i32, %c0_i32_0 : i32, i32
  }
  func.func @transform_2(%arg0: i32) -> (i32, i32) {
    %c0_i32 = arith.constant 0 : i32
    %c0_i32_0 = arith.constant 0 : i32
    %c0_i32_1 = arith.constant 0 : i32
    return %c0_i32, %c0_i32_0 : i32, i32
  }
  func.func @transform_3(%arg0: i32) -> (i32, i32) {
    %c0_i32 = arith.constant 0 : i32
    %c0_i32_0 = arith.constant 0 : i32
    %c0_i32_1 = arith.constant 0 : i32
    return %c0_i32, %c0_i32_0 : i32, i32
  }
  func.func @transform_4(%arg0: i32) -> (i32, i32) {
    %c0_i32 = arith.constant 0 : i32
    %c0_i32_0 = arith.constant 0 : i32
    %c0_i32_1 = arith.constant 0 : i32
    return %c0_i32, %c0_i32_0 : i32, i32
  }
  func.func @transform_5(%arg0: i32) -> (i32, i32) {
    %c0_i32 = arith.constant 0 : i32
    %c0_i32_0 = arith.constant 0 : i32
    %c0_i32_1 = arith.constant 0 : i32
    return %c0_i32, %c0_i32_0 : i32, i32
  }
  func.func @transform_6(%arg0: i32) -> (i32, i32) {
    %c0_i32 = arith.constant 0 : i32
    %c0_i32_0 = arith.constant 0 : i32
    %c0_i32_1 = arith.constant 0 : i32
    return %c0_i32, %c0_i32_0 : i32, i32
  }
  func.func @transform_7(%arg0: i32) -> (i32, i32) {
    %c0_i32 = arith.constant 0 : i32
    %c0_i32_0 = arith.constant 0 : i32
    return %arg0, %c0_i32 : i32, i32
  }
}

</mosaic_0001>

<bundles_post_ra>
// kernel: tpu_custom_call.1
= control target key start
LH: loop header
LB: loop body
LE: loop exit
PB: predicated region body
PF: predicated region fallthrough
CT: control target
= control target key end

     0   :  { %12 = vsyncpa [#allocation3], 0  ;;  %s920_s0 = inlined_call_operand.hbm [shape: bf16[8,128], index: 0, kind: input, shape index: {}]   ;;  %s921_s1 = inlined_call_operand.hbm [shape: bf16[128,256], index: 1, kind: input, shape index: {}]   ;;  %s922_s2 = inlined_call_operand.vmem [shape: f32[1,256], index: 2, kind: input, shape index: {}]   ;;  %s923_s3 = inlined_call_operand.hbm [shape: bf16[128,128], index: 3, kind: input, shape index: {}]   ;;  %s924_s4 = inlined_call_operand.vmem [shape: f32[1,128], index: 4, kind: input, shape index: {}]   ;;  %s925_s5 = inlined_call_operand.hbm [shape: bf16[128,128], index: 5, kind: input, shape index: {}]   ;;  %s926_s6 = inlined_call_operand.vmem [shape: f32[1,128], index: 6, kind: input, shape index: {}]   ;;  %s927_s7 = inlined_call_operand.hbm [shape: bf16[8,128], index: 7, kind: output, shape index: {}]  }
   0x1   :  { %13 = vsyncpa [#allocation6], 0 }
   0x2   :  { %14 = vsyncpa [#allocation9], 0 }
   0x3   :  { %15 = vsyncpa [#allocation4], 0  ;;  %s777_s24 = smov [#allocation5]   ;;  %s659_s28 = scalar_lea.hbm %s921_s1, 2048 }
   0x4   :  { %s31_s25 = sshll.u32 %s777_s24, 4  ;;  %p660_p0 = scmp.ne.s32.totalorder %s921_s1, %s659_s28  ;;  %s32_s25 = int_to_ptr.vmem [resolvable:$true] %s31_s25 }
   0x5   :  { %p663_p1 = scmp.lt.u32.totalorder %s659_s28, %s921_s1 }
   0x7   :  { %p665_p2 = pnand %p663_p1, %p660_p0 }
   0x9   :  { %668 = shalt.err (!%p665_p2)
}
   0xa   :  { %s669_s10 = scalar_lea.vmem %s32_s25, 2048  ;;  %p674_p4 = scmp.lt.s32.totalorder %s32_s25, %s32_s25 }
   0xb   :  { %p670_p3 = scmp.ne.s32.totalorder %s32_s25, %s669_s10  ;;  %p675_p5 = scmp.lt.s32.totalorder %s669_s10, %s669_s10 }
   0xd   :  { %p676_p6 = por %p675_p5, %p674_p4 }
   0xf   :  { %p677_p7 = pnand %p676_p6, %p670_p3 }
  0x11   :  { %680 = shalt.err (!%p677_p7)
}
  0x12   :  { %s778_s11 = smov 128   ;;  %s779_s12 = smov 8  }
  0x13   :  { %37 = dma.hbm_to_vmem [thread:$0]  %s921_s1, 2048, %s32_s25, [#allocation6], %s778_s11, %s778_s11, %s779_s12  }
  0x14   :  { %s780_s15 = smov [#allocation2]   ;;  %s781_s17 = smov [#allocation7]  }
  0x15   :  { %s22_s16 = sshll.u32 %s780_s15, 4  ;;  %s45_s18 = sshll.u32 %s781_s17, 4  ;;  %s23_s16 = int_to_ptr.vmem [resolvable:$true] %s22_s16  ;;  %s46_s18 = int_to_ptr.vmem [resolvable:$true] %s45_s18 }
  0x16   :  { %s681_s21 = scalar_lea.hbm %s920_s0, 64 }
  0x17   :  { %p682_p8 = scmp.ne.s32.totalorder %s920_s0, %s681_s21  ;;  %p685_p9 = scmp.lt.u32.totalorder %s681_s21, %s920_s0 }
  0x19   :  { %p687_p10 = pnand %p685_p9, %p682_p8 }
  0x1b   :  { %690 = shalt.err (!%p687_p10)
}
  0x1c   :  { %s691_s1 = scalar_lea.vmem %s23_s16, 64  ;;  %p696_p12 = scmp.lt.s32.totalorder %s23_s16, %s23_s16 }
  0x1d   :  { %p692_p11 = scmp.ne.s32.totalorder %s23_s16, %s691_s1  ;;  %p697_p13 = scmp.lt.s32.totalorder %s691_s1, %s691_s1 }
  0x1f   :  { %p698_p0 = por %p697_p13, %p696_p12 }
  0x21   :  { %p699_p1 = pnand %p698_p0, %p692_p11 }
  0x23   :  { %702 = shalt.err (!%p699_p1)
}
  0x24   :  { %25 = dma.hbm_to_vmem [thread:$0]  %s920_s0, 64, %s23_s16, [#allocation3]  }
  0x25   :  { %s703_s30 = scalar_lea.hbm %s923_s3, 1024 }
  0x26   :  { %p704_p2 = scmp.ne.s32.totalorder %s923_s3, %s703_s30  ;;  %p707_p3 = scmp.lt.u32.totalorder %s703_s30, %s923_s3 }
  0x28   :  { %p709_p4 = pnand %p707_p3, %p704_p2 }
  0x2a   :  { %712 = shalt.err (!%p709_p4)
}
  0x2b   :  { %s713_s12 = scalar_lea.vmem %s46_s18, 1024  ;;  %p718_p6 = scmp.lt.s32.totalorder %s46_s18, %s46_s18 }
  0x2c   :  { %p714_p5 = scmp.ne.s32.totalorder %s46_s18, %s713_s12  ;;  %p719_p7 = scmp.lt.s32.totalorder %s713_s12, %s713_s12 }
  0x2e   :  { %p720_p8 = por %p719_p7, %p718_p6 }
  0x30   :  { %p721_p9 = pnand %p720_p8, %p714_p5 }
  0x32   :  { %724 = shalt.err (!%p721_p9)
}
  0x33   :  { %s782_s0 = smov 64   ;;  %s783_s13 = smov 4  }
  0x34   :  { %51 = dma.hbm_to_vmem [thread:$0]  %s923_s3, 1024, %s46_s18, [#allocation6], %s782_s0, %s782_s0, %s783_s13  }
  0x35   :  { %s784_s16 = smov [#allocation8]   ;;  %s725_s21 = scalar_lea.hbm %s925_s5, 1024 }
  0x36   :  { %s59_s17 = sshll.u32 %s784_s16, 4  ;;  %p726_p10 = scmp.ne.s32.totalorder %s925_s5, %s725_s21  ;;  %s60_s17 = int_to_ptr.vmem [resolvable:$true] %s59_s17 }
  0x37   :  { %p729_p11 = scmp.lt.u32.totalorder %s725_s21, %s925_s5 }
  0x39   :  { %p731_p12 = pnand %p729_p11, %p726_p10 }
  0x3b   :  { %734 = shalt.err (!%p731_p12)
}
  0x3c   :  { %s735_s1 = scalar_lea.vmem %s60_s17, 1024  ;;  %p740_p0 = scmp.lt.s32.totalorder %s60_s17, %s60_s17 }
  0x3d   :  { %p736_p13 = scmp.ne.s32.totalorder %s60_s17, %s735_s1  ;;  %p741_p1 = scmp.lt.s32.totalorder %s735_s1, %s735_s1 }
  0x3f   :  { %p742_p2 = por %p741_p1, %p740_p0 }
  0x41   :  { %p743_p3 = pnand %p742_p2, %p736_p13 }
  0x43   :  { %746 = shalt.err (!%p743_p3)
}
  0x44   :  { %65 = dma.hbm_to_vmem [thread:$0]  %s925_s5, 1024, %s60_s17, [#allocation9], %s782_s0, %s782_s0, %s783_s13  }
  0x45   :  { %769 = dma.done.wait [#allocation3], 64  }
  0x46   :  { %770 = vsyncadd [#allocation3], 4294967232 }
  0x47   :  { %771 = dma.done.wait [#allocation6], 3072  }
  0x48   :  { %772 = vsyncadd [#allocation6], 4294964224 }
  0x49   :  { %773 = dma.done.wait [#allocation9], 1024  }
  0x4a   :  { %774 = vsyncadd [#allocation9], 4294966272  ;;  %v785_v0 = vmov 0   ;;  %v609_v1 = vld [vmem:[#allocation5 + $0x4] ss:$8 sps:$4 sm:$0xff]   ;;  %v101_v18 = vlaneseq  ;;  %v786_v32 = vmov 0.0  }
  0x4b   :  { %223 = vmatprep.mubr.bf16.mxu0 %v785_v0  ;;  %v611_v2 = vld [vmem:[#allocation5] ss:$8 sps:$4 sm:$0xff]   ;;  %191 = vmatprep.subr.bf16.mxu0 %v609_v1  ;;  %v612_v3 = vld [vmem:[#allocation5 + $0x14] ss:$8 sps:$4 sm:$0xff]   ;;  %v614_v4 = vld [vmem:[#allocation5 + $0x10] ss:$8 sps:$4 sm:$0xff]  }
  0x4c   :  { %192 = vmatpush1.bf16.msra.mxu0 %v611_v2  ;;  %v615_v5 = vld [vmem:[#allocation5 + $0x24] ss:$8 sps:$4 sm:$0xff]   ;;  %v617_v6 = vld [vmem:[#allocation5 + $0x20] ss:$8 sps:$4 sm:$0xff]   ;;  %v618_v7 = vld [vmem:[#allocation5 + $0x34] ss:$8 sps:$4 sm:$0xff]   ;;  %557 = vmatprep.subr.bf16.mxu1 %v786_v32 }
  0x4d   :  { %193 = vmatprep.subr.bf16.mxu0 %v612_v3  ;;  %v620_v8 = vld [vmem:[#allocation5 + $0x30] ss:$8 sps:$4 sm:$0xff]   ;;  %v621_v9 = vld [vmem:[#allocation5 + $0x44] ss:$8 sps:$4 sm:$0xff]   ;;  %v623_v10 = vld [vmem:[#allocation5 + $0x40] ss:$8 sps:$4 sm:$0xff]  }
  0x4e   :  { %v624_v11 = vld [vmem:[#allocation5 + $0x54] ss:$8 sps:$4 sm:$0xff]   ;;  %v626_v12 = vld [vmem:[#allocation5 + $0x50] ss:$8 sps:$4 sm:$0xff]   ;;  %v627_v13 = vld [vmem:[#allocation5 + $0x64] ss:$8 sps:$4 sm:$0xff]  }
  0x4f   :  { %v629_v14 = vld [vmem:[#allocation5 + $0x60] ss:$8 sps:$4 sm:$0xff]   ;;  %v630_v15 = vld [vmem:[#allocation5 + $0x74] ss:$8 sps:$4 sm:$0xff]   ;;  %v632_v16 = vld [vmem:[#allocation5 + $0x70] ss:$8 sps:$4 sm:$0xff]  }
  0x50   :  { %194 = vmatpush1.bf16.msra.mxu0 %v614_v4  ;;  %v877_v17 = vld [vmem:[#allocation2] sm:$0xf]  ;;  %v102_v19 = vshrl.u32 %v101_v18, 7  ;;  %v633_v31 = vld [vmem:[#allocation7] sm:$0xff]   ;;  %v634_v33 = vld [vmem:[#allocation7 + $0x8] sm:$0xff]   ;;  %vm787_vm0 = vmmov 0  }
  0x51   :  { %195 = vmatprep.subr.bf16.mxu0 %v615_v5  ;;  %v99_v21 = vld [vmem:[%s922_s2] sm:$0x3]  ;;  %558 = vmatpush3.bf16.msra.mxu1 %v633_v31  ;;  %v635_v42 = vld [vmem:[#allocation7 + $0x10] sm:$0xff]   ;;  %v637_v44 = vld [vmem:[#allocation7 + $0x20] sm:$0xff]   ;;  %v82_v53 = vunpack.c.l.bf16 %v877_v17 }
  0x52   :  { %v103_v20 = vsub.s32 0, %v102_v19  ;;  %v107_v23 = vsub.s32 1, %v102_v19  ;;  %559 = vmatprep.subr.bf16.mxu1 %v786_v32  ;;  %v636_v43 = vld [vmem:[#allocation7 + $0x18] sm:$0xff]   ;;  %573 = vmatprep.mubr.msk.bf16.mxu1 %vm787_vm0, %v786_v32  ;;  %v638_v45 = vld [vmem:[#allocation7 + $0x28] sm:$0xff]   ;;  %v639_v46 = vld [vmem:[#allocation7 + $0x30] sm:$0xff]  }
  0x53   :  { %v640_v47 = vld [vmem:[#allocation7 + $0x38] sm:$0xff]   ;;  %v641_v48 = vld [vmem:[#allocation8] sm:$0xff]   ;;  %v642_v49 = vld [vmem:[#allocation8 + $0x8] sm:$0xff]  }
  0x54   :  { %196 = vmatpush1.bf16.msra.mxu0 %v617_v6  ;;  %v104_v22 = vrot.slane %v99_v21, %v103_v20  ;;  %v108_v26 = vrot.slane %v99_v21, %v107_v23  ;;  %v643_v61 = vld [vmem:[#allocation8 + $0x10] sm:$0xff]   ;;  %v644_v62 = vld [vmem:[#allocation8 + $0x18] sm:$0xff]   ;;  %v645_v63 = vld [vmem:[#allocation8 + $0x20] sm:$0xff]  }
  0x55   :  { %197 = vmatprep.subr.bf16.mxu0 %v618_v7  ;;  %560 = vmatpush3.bf16.msra.mxu1 %v634_v33  ;;  %v646_v0 = vld [vmem:[#allocation8 + $0x28] sm:$0xff]   ;;  %v647_v1 = vld [vmem:[#allocation8 + $0x30] sm:$0xff]   ;;  %v648_v2 = vld [vmem:[#allocation8 + $0x38] sm:$0xff]  }
  0x56   :  { %561 = vmatprep.subr.bf16.mxu1 %v786_v32  ;;  %v520_v3 = vld [vmem:[%s924_s4] ss:$0 sm:$0xff]  ;;  %s788_s4 = smov [#allocation10]  }
  0x57   :  { %s493_s30 = sshll.u32 %s788_s4, 4  ;;  %s494_s30 = int_to_ptr.vmem [resolvable:$true] %s493_s30 }
  0x58   :  { %198 = vmatpush1.bf16.msra.mxu0 %v620_v8  ;;  %s747_s8 = scalar_lea.vmem %s494_s30, 64  ;;  %p752_p5 = scmp.lt.s32.totalorder %s494_s30, %s494_s30 }
  0x59   :  { %199 = vmatprep.subr.bf16.mxu0 %v621_v9  ;;  %562 = vmatpush3.bf16.msra.mxu1 %v635_v42  ;;  %p748_p4 = scmp.ne.s32.totalorder %s494_s30, %s747_s8  ;;  %p753_p6 = scmp.lt.s32.totalorder %s747_s8, %s747_s8 }
  0x5a   :  { %563 = vmatprep.subr.bf16.mxu1 %v786_v32 }
  0x5b   :  { %p754_p7 = por %p753_p6, %p752_p5 }
  0x5c   :  { %200 = vmatpush1.bf16.msra.mxu0 %v623_v10 }
  0x5d   :  { %201 = vmatprep.subr.bf16.mxu0 %v624_v11  ;;  %564 = vmatpush3.bf16.msra.mxu1 %v636_v43  ;;  %p755_p8 = pnand %p754_p7, %p748_p4 }
  0x5e   :  { %565 = vmatprep.subr.bf16.mxu1 %v786_v32 }
  0x60   :  { %202 = vmatpush1.bf16.msra.mxu0 %v626_v12 }
  0x61   :  { %203 = vmatprep.subr.bf16.mxu0 %v627_v13  ;;  %566 = vmatpush3.bf16.msra.mxu1 %v637_v44 }
  0x62   :  { %567 = vmatprep.subr.bf16.mxu1 %v786_v32 }
  0x64   :  { %204 = vmatpush1.bf16.msra.mxu0 %v629_v14 }
  0x65   :  { %205 = vmatprep.subr.bf16.mxu0 %v630_v15  ;;  %568 = vmatpush3.bf16.msra.mxu1 %v638_v45 }
  0x66   :  { %569 = vmatprep.subr.bf16.mxu1 %v786_v32 }
  0x68   :  { %206 = vmatpush1.bf16.msra.mxu0 %v632_v16  ;;  %v530_v16 = vld [vmem:[%s926_s6] ss:$0 sm:$0xff] }
  0x69   :  { %577 = vmatprep.subr.bf16.mxu0 %v786_v32  ;;  %570 = vmatpush3.bf16.msra.mxu1 %v639_v46 }
  0x6a   :  { %571 = vmatprep.subr.bf16.mxu1 %v786_v32 }
  0x6b   :  { %224 = vmatmul.mubr.bf16.vlgmr.msra.gmra.mrb[0].mxu0 %v877_v17 }
  0x6c   :  { %593 = vmatprep.mubr.msk.bf16.mxu0 %vm787_vm0, %v786_v32  ;;  %578 = vmatpush3.bf16.msra.mxu0 %v641_v48 }
  0x6d   :  { %572 = vmatpush3.bf16.msra.mxu1 %v640_v47  ;;  %579 = vmatprep.subr.bf16.mxu0 %v786_v32 }
  0x70   :  { %580 = vmatpush3.bf16.msra.mxu0 %v642_v49 }
  0x71   :  { %581 = vmatprep.subr.bf16.mxu0 %v786_v32 }
  0x74   :  { %582 = vmatpush3.bf16.msra.mxu0 %v643_v61 }
  0x75   :  { %583 = vmatprep.subr.bf16.mxu0 %v786_v32 }
  0x78   :  { %584 = vmatpush3.bf16.msra.mxu0 %v644_v62 }
  0x79   :  { %585 = vmatprep.subr.bf16.mxu0 %v786_v32 }
  0x7c   :  { %586 = vmatpush3.bf16.msra.mxu0 %v645_v63 }
  0x7d   :  { %587 = vmatprep.subr.bf16.mxu0 %v786_v32 }
  0x80   :  { %588 = vmatpush3.bf16.msra.mxu0 %v646_v0 }
  0x81   :  { %589 = vmatprep.subr.bf16.mxu0 %v786_v32 }
  0x84   :  { %590 = vmatpush3.bf16.msra.mxu0 %v647_v1 }
  0x85   :  { %591 = vmatprep.subr.bf16.mxu0 %v786_v32 }
  0x88   :  { %592 = vmatpush3.bf16.msra.mxu0 %v648_v2 }
 0x13e   :  { %v225_v24 = vpop.f32.mrb[0].mxu0 }
 0x13f   :  { %v226_v25 = vadd.f32 %v225_v24, %v104_v22  ;;  %v227_v27 = vpop.f32.mrb[1].mxu0 }
 0x140   :  { %v229_v28 = vpop.f32.mrb[2].mxu0  ;;  %v228_v30 = vadd.f32 %v227_v27, %v108_v26 }
 0x141   :  { %v230_v29 = vpop.f32.mrb[3].mxu0  ;;  %232 = vmax.xlane.f32.xlu0 %v226_v25 }
 0x145   :  { %243 = vmax.xlane.f32.xlu0 %v228_v30 }
 0x1ce   :  { %v233_v34 = vpop.xlane.xlu0 %232 }
 0x1cf   :  { %v234_v35 = vsub.f32 %v226_v25, %v233_v34 }
 0x1d1   :  { %v235_v36 = vmul.f32 1.442695, %v234_v35 }
 0x1d2   :  { %v244_v37 = vpop.xlane.xlu0 %243 }
 0x1d3   :  { %649 = vpow2.f32 %v235_v36  ;;  %v245_v38 = vsub.f32 %v228_v30, %v244_v37 }
 0x1d5   :  { %v246_v39 = vmul.f32 1.442695, %v245_v38 }
 0x1d7   :  { %651 = vpow2.f32 %v246_v39 }
 0x1dd   :  { %v650_v40 = vpop.eup %649 }
 0x1de   :  { %237 = vadd.xlane.f32.xlu1 %v650_v40 }
 0x1e1   :  { %v652_v41 = vpop.eup %651 }
 0x1e2   :  { %248 = vadd.xlane.f32.xlu1 %v652_v41 }
 0x26b   :  { %v238_v50 = vpop.xlane.xlu1 %237 }
 0x26c   :  { %653 = vrcp.f32 %v238_v50 }
 0x26f   :  { %v249_v51 = vpop.xlane.xlu1 %248 }
 0x270   :  { %655 = vrcp.f32 %v249_v51 }
 0x276   :  { %v654_v52 = vpop.eup %653 }
 0x277   :  { %v240_v54 = vmul.f32 %v654_v52, %v650_v40 }
 0x279   :  { %v241_v57 = vmul.f32 %v240_v54, %v82_v53 }
 0x27a   :  { %v656_v55 = vpop.eup %655 }
 0x27b   :  { %v251_v56 = vmul.f32 %v656_v55, %v652_v41 }
 0x27d   :  { %v252_v58 = vmul.f32 %v251_v56, %v82_v53 }
 0x27f   :  { %v253_v59 = vadd.f32 %v252_v58, %v241_v57 }
 0x281   :  { %v254_v60 = vpack.c.bf16 %v253_v59, %v253_v59 }
 0x283   :  { %574 = vmatmul.mubr.bf16.vlgmr.msra.gmra.mrb[0].mxu1 %v254_v60 }
 0x356   :  { %v360_v4 = vpop.f32.mrb[0].mxu1 }
 0x357   :  { %v361_v5 = vadd.f32 %v520_v3, %v360_v4  ;;  %v575_v6 = vpop.f32.mrb[1].mxu1 }
 0x358   :  { %v363_v7 = vpop.f32.mrb[2].mxu1 }
 0x359   :  { %v367_v8 = vmul.f32 1.442695, %v361_v5  ;;  %v576_v9 = vpop.f32.mrb[3].mxu1  ;;  %vm366_vm1 = vcmp.gt.f32.partialorder %v361_v5, 0.0 }
 0x35b   :  { %657 = vpow2.f32 %v367_v8 }
 0x365   :  { %v658_v10 = vpop.eup %657 }
 0x366   :  { %v529_v11 = vadd.f32 -1.0, %v658_v10 }
 0x368   :  { %v370_v12 = vmul.f32 1.6732632, %v529_v11 }
 0x36a   :  { %v371_v13 = vsel %vm366_vm1, %v361_v5, %v370_v12 }
 0x36b   :  { %v372_v14 = vmul.f32 1.050701, %v371_v13 }
 0x36d   :  { %v373_v15 = vpack.c.bf16 %v372_v14, %v372_v14 }
 0x36f   :  { %594 = vmatmul.mubr.bf16.vlgmr.msra.gmra.mrb[4].mxu0 %v373_v15 }
 0x442   :  { %v479_v17 = vpop.f32.mrb[4].mxu0 }
 0x443   :  { %v480_v18 = vadd.f32 %v530_v16, %v479_v17  ;;  %v595_v19 = vpop.f32.mrb[5].mxu0 }
 0x444   :  { %v482_v20 = vpop.f32.mrb[6].mxu0 }
 0x445   :  { %v485_v21 = vpack.c.bf16 %v480_v18, %v480_v18  ;;  %v596_v22 = vpop.f32.mrb[7].mxu0 }
 0x447   :  { %486 = vst [vmem:[#allocation10] sm:$0xf] %v485_v21 }
 0x448   :  { %758 = shalt.err (!%p755_p8)
}
 0x449   :  { %s759_s6 = scalar_lea.hbm %s927_s7, 64 }
 0x44a   :  { %p760_p9 = scmp.ne.s32.totalorder %s927_s7, %s759_s6  ;;  %p763_p10 = scmp.lt.u32.totalorder %s759_s6, %s927_s7 }
 0x44c   :  { %p765_p11 = pnand %p763_p10, %p760_p9 }
 0x44e   :  { %768 = shalt.err (!%p765_p11)
}
 0x44f   :  { %496 = dma.vmem_to_hbm [thread:$0]  %s494_s30, 64, %s927_s7, [#allocation4]  }
 0x450   :  { %775 = dma.done.wait [#allocation4], 64  }
 0x451   :  { %776 = vsyncadd [#allocation4], 4294967232 }
 0x452   :  { %500 = vsyncpa [#allocation3], 1 }
 0x453   :  { %501 = vsyncpa [#allocation6], 1 }
 0x454   :  { %502 = vsyncpa [#allocation9], 1 }
 0x455   :  { %503 = vsyncpa [#allocation4], 1 }

</bundles_post_ra>
